<compile_context>
chip_gen: v7x
topology: tpu7x:2x2x1
jax: 0.10.0
libtpu: 0.0.40
codegen_flags: <defaults>
</compile_context>

<pallas_src>
import jax
import jax.numpy as jnp
from jax.experimental import pallas as pl
from jax.experimental.pallas import tpu as pltpu

PROJ = 256          # hard-coded projection width in the PyTorch module
NUM_CLASSES = 3     # mortality / LOS / vent logits
OUT_PAD = 128       # lane-dense padded output width (kernel writes (TB, 128))


def _round_up(x, m):
    return (x + m - 1) // m * m


def _fused_head_kernel(struct_ref, text_ref,
                       w_ts_ref, b_ts_ref,
                       w_tx_ref, b_tx_ref,
                       w1a_ref, w1b_ref, b1_ref,
                       w2_ref, b2_ref,
                       out_ref):
    # Activations arrive as f32 straight from HBM; cast to bf16 just before
    # the MXU dots (f32 accumulation).  The cast rides the VPU slot.
    s = struct_ref[...].astype(jnp.bfloat16)
    t = text_ref[...].astype(jnp.bfloat16)

    # ts_projector: Linear(behrt_hidden -> 256) + ReLU
    ts = jnp.dot(s, w_ts_ref[...], preferred_element_type=jnp.float32)
    ts = jnp.maximum(ts + b_ts_ref[...], 0.0).astype(jnp.bfloat16)

    # text_projector: Linear(text_embed_size -> 256) + ReLU
    tx = jnp.dot(t, w_tx_ref[...], preferred_element_type=jnp.float32)
    tx = jnp.maximum(tx + b_tx_ref[...], 0.0).astype(jnp.bfloat16)

    # classifier layer 1 on concat([ts, tx], dim=1):
    # cat @ W1 == ts @ W1[:256] + tx @ W1[256:]  (split matmul avoids a lane concat)
    h = (jnp.dot(ts, w1a_ref[...], preferred_element_type=jnp.float32)
         + jnp.dot(tx, w1b_ref[...], preferred_element_type=jnp.float32)
         + b1_ref[...])
    h = jnp.maximum(h, 0.0).astype(jnp.bfloat16)
    # Dropout(0.1): identity at inference time.

    # classifier layer 2: Linear(hidden -> 3), zero-padded to 128 lanes.
    logits = jnp.dot(h, w2_ref[...], preferred_element_type=jnp.float32) + b2_ref[...]
    out_ref[...] = logits.astype(out_ref.dtype)


def _pick_batch_tile(B):
    # Tiny batches: one tile covering exactly B rows (block == full dim is
    # exempt from the 8/128 divisibility rule) -> no wasted DMA / stores.
    if B <= 128:
        return B
    # Larger batches: big tiles amortize the ~0.35us fixed per-grid-step cost
    # (v5e/v6e), while keeping the grid length >= 2 so v7x's two TensorCores
    # both get work via the "parallel" axis.
    return min(512, max(128, _round_up(pl.cdiv(B, 2), 128)))


def multimodal_head(structured_emb, text_emb, kp):
    """Fused projector+classifier Pallas kernel. Returns (B, 3) f32 logits."""
    structured_emb = structured_emb.astype(jnp.float32)
    text_emb = text_emb.astype(jnp.float32)

    B, K_s = structured_emb.shape        # true behrt hidden width (e.g. 64)
    K_t = text_emb.shape[1]              # true text embed width
    H = kp["w1a"].shape[1]               # padded classifier hidden (mult of 128)

    TB = _pick_batch_tile(B)
    grid = (pl.cdiv(B, TB),)             # ragged last tile; rows independent

    act_spec = lambda k: pl.BlockSpec((TB, k), lambda i: (i, 0))
    w_spec = lambda a: pl.BlockSpec(a.shape, lambda i: (0, 0))   # VMEM-resident

    weights = (kp["w_ts"], kp["b_ts"], kp["w_tx"], kp["b_tx"],
               kp["w1a"], kp["w1b"], kp["b1"], kp["w2"], kp["b2"])

    flops = 2 * B * (K_s * PROJ + K_t * PROJ + 2 * PROJ * H + H * OUT_PAD)
    bytes_accessed = (int(structured_emb.size) * 4 + int(text_emb.size) * 4
                      + sum(int(w.size) * w.dtype.itemsize for w in weights)
                      + B * OUT_PAD * 2)

    out = pl.pallas_call(
        _fused_head_kernel,
        out_shape=jax.ShapeDtypeStruct((B, OUT_PAD), jnp.bfloat16),
        grid=grid,
        in_specs=[act_spec(K_s), act_spec(K_t)] + [w_spec(w) for w in weights],
        out_specs=pl.BlockSpec((TB, OUT_PAD), lambda i: (i, 0)),
        compiler_params=pltpu.CompilerParams(
            dimension_semantics=("parallel",),
            vmem_limit_bytes=32 << 20),      # generous; usage is < 3 MiB
        cost_estimate=pl.CostEstimate(flops=flops, transcendentals=0,
                                      bytes_accessed=bytes_accessed),
    )(structured_emb, text_emb, *weights)

    # Single slice of the padded output, upcast once; columns are split by the
    # caller on the tiny (B, 3) result.
    return out[:, :NUM_CLASSES].astype(jnp.float32)


def behrt_forward(input_ids, attn_mask, emb_table):
    # TODO(synk): BEHRT is an injected external transformer encoder; stubbed here as
    # deterministic embedding lookup + attention-masked mean pooling -> (B, behrt_hidden).
    emb = jnp.take(emb_table, input_ids, axis=0)          # (B, S, H)
    m = attn_mask[..., None].astype(jnp.float32)          # (B, S, 1)
    return (emb * m).sum(axis=1) / jnp.maximum(m.sum(axis=1), 1.0)


def forward(input_ids_struct, attn_mask_struct, aggregated_text_embedding, params):
    structured_emb = behrt_forward(input_ids_struct, attn_mask_struct, params["behrt_emb"])
    logits = multimodal_head(structured_emb, aggregated_text_embedding, params["head"])
    mortality_logits = logits[:, 0:1]
    los_logits = logits[:, 1:2]
    vent_logits = logits[:, 2:3]
    return mortality_logits, los_logits, vent_logits


def init_params(key, behrt_hidden, text_embed_size, hidden_size, vocab_size):
    ks = jax.random.split(key, 9)

    def linear(kw, kb, fan_in, fan_out):
        # Matches torch nn.Linear init: uniform(-1/sqrt(fan_in), +) for W and b.
        scale = 1.0 / jnp.sqrt(jnp.float32(fan_in))
        w = jax.random.uniform(kw, (fan_in, fan_out), jnp.float32, -scale, scale)
        b = jax.random.uniform(kb, (fan_out,), jnp.float32, -scale, scale)
        return w, b

    w_ts, b_ts = linear(ks[1], ks[2], behrt_hidden, PROJ)
    w_tx, b_tx = linear(ks[3], ks[4], text_embed_size, PROJ)
    w1, b1 = linear(ks[5], ks[6], 2 * PROJ, hidden_size)
    w2, b2 = linear(ks[7], ks[8], hidden_size, NUM_CLASSES)

    H = _round_up(hidden_size, 128)

    def pad_cols(a, c):
        return jnp.pad(a, ((0, 0), (0, c - a.shape[1])))

    def pad2(a, r, c):
        return jnp.pad(a, ((0, r - a.shape[0]), (0, c - a.shape[1])))

    head = {
        # Contraction (K) dims keep their true widths to match the unpadded
        # activations; only the classifier hidden and the 3->128 class lanes
        # are zero-padded (padding preserves the math).
        "w_ts": w_ts.astype(jnp.bfloat16),
        "b_ts": b_ts.reshape(1, PROJ),
        "w_tx": w_tx.astype(jnp.bfloat16),
        "b_tx": b_tx.reshape(1, PROJ),
        "w1a": pad_cols(w1[:PROJ], H).astype(jnp.bfloat16),
        "w1b": pad_cols(w1[PROJ:], H).astype(jnp.bfloat16),
        "b1": pad_cols(b1.reshape(1, hidden_size), H),
        "w2": pad2(w2, H, OUT_PAD).astype(jnp.bfloat16),
        "b2": pad_cols(b2.reshape(1, NUM_CLASSES), OUT_PAD),
    }
    return {
        "behrt_emb": 0.02 * jax.random.normal(ks[0], (vocab_size, behrt_hidden), jnp.float32),
        "head": head,
    }


if __name__ == "__main__":
    B, S = 8, 16
    VOCAB = 100
    BEHRT_HIDDEN = 64
    TEXT_EMBED = 128
    HIDDEN = 128

    key = jax.random.PRNGKey(0)
    kp, k1, k2, k3 = jax.random.split(key, 4)
    params = init_params(kp, BEHRT_HIDDEN, TEXT_EMBED, HIDDEN, VOCAB)

    input_ids_struct = jax.random.randint(k1, (B, S), 0, VOCAB, dtype=jnp.int32)
    attn_mask_struct = (jax.random.uniform(k2, (B, S)) > 0.2).astype(jnp.int32)
    aggregated_text_embedding = jax.random.normal(k3, (B, TEXT_EMBED), jnp.float32)

    mortality, los, vent = jax.jit(forward)(
        input_ids_struct, attn_mask_struct, aggregated_text_embedding, params)
    jax.block_until_ready((mortality, los, vent))

    assert mortality.shape == (B, 1) and los.shape == (B, 1) and vent.shape == (B, 1)
    print("KERNEL_OK")
</pallas_src>

<mosaic_0001>
module attributes {stable_mosaic.version = 11 : i64} {
  func.func @_fused_head_kernel(%arg0: i32, %arg1: memref<8x64xf32, #tpu.memory_space<vmem>>, %arg2: memref<8x128xf32, #tpu.memory_space<vmem>>, %arg3: memref<64x256xbf16, #tpu.memory_space<vmem>>, %arg4: memref<1x256xf32, #tpu.memory_space<vmem>>, %arg5: memref<128x256xbf16, #tpu.memory_space<vmem>>, %arg6: memref<1x256xf32, #tpu.memory_space<vmem>>, %arg7: memref<256x128xbf16, #tpu.memory_space<vmem>>, %arg8: memref<256x128xbf16, #tpu.memory_space<vmem>>, %arg9: memref<1x128xf32, #tpu.memory_space<vmem>>, %arg10: memref<128x128xbf16, #tpu.memory_space<vmem>>, %arg11: memref<1x128xf32, #tpu.memory_space<vmem>>, %arg12: memref<8x128xbf16, #tpu.memory_space<vmem>>) attributes {dimension_semantics = [#tpu.dimension_semantics<parallel>], iteration_bounds = array<i64: 1>, scalar_prefetch = 0 : i64, scratch_operands = 0 : i64, tpu.core_type = #tpu.core_type<tc>, window_params = [{transform_indices = @transform_0, window_bounds = array<i64: 8, 64>}, {transform_indices = @transform_1, window_bounds = array<i64: 8, 128>}, {pipeline_mode = #tpu.pipeline_mode<synchronous>, transform_indices = @transform_2, window_bounds = array<i64: 64, 256>}, {pipeline_mode = #tpu.pipeline_mode<synchronous>, transform_indices = @transform_3, window_bounds = array<i64: 1, 256>}, {pipeline_mode = #tpu.pipeline_mode<synchronous>, transform_indices = @transform_4, window_bounds = array<i64: 128, 256>}, {pipeline_mode = #tpu.pipeline_mode<synchronous>, transform_indices = @transform_5, window_bounds = array<i64: 1, 256>}, {pipeline_mode = #tpu.pipeline_mode<synchronous>, transform_indices = @transform_6, window_bounds = array<i64: 256, 128>}, {pipeline_mode = #tpu.pipeline_mode<synchronous>, transform_indices = @transform_7, window_bounds = array<i64: 256, 128>}, {pipeline_mode = #tpu.pipeline_mode<synchronous>, transform_indices = @transform_8, window_bounds = array<i64: 1, 128>}, {pipeline_mode = #tpu.pipeline_mode<synchronous>, transform_indices = @transform_9, window_bounds = array<i64: 128, 128>}, {pipeline_mode = #tpu.pipeline_mode<synchronous>, transform_indices = @transform_10, window_bounds = array<i64: 1, 128>}, {transform_indices = @transform_11, window_bounds = array<i64: 8, 128>}]} {
    %c0 = arith.constant 0 : index
    %c0_0 = arith.constant 0 : index
    %0 = vector.load %arg1[%c0, %c0_0] : memref<8x64xf32, #tpu.memory_space<vmem>>, vector<8x64xf32>
    %1 = arith.truncf %0 : vector<8x64xf32> to vector<8x64xbf16>
    %c0_1 = arith.constant 0 : index
    %c0_2 = arith.constant 0 : index
    %2 = vector.load %arg2[%c0_1, %c0_2] : memref<8x128xf32, #tpu.memory_space<vmem>>, vector<8x128xf32>
    %3 = arith.truncf %2 : vector<8x128xf32> to vector<8x128xbf16>
    %c0_3 = arith.constant 0 : index
    %c0_4 = arith.constant 0 : index
    %4 = vector.load %arg3[%c0_3, %c0_4] : memref<64x256xbf16, #tpu.memory_space<vmem>>, vector<64x256xbf16>
    %cst = arith.constant dense<0.000000e+00> : vector<8x256xf32>
    %5 = tpu.matmul %1, %4, %cst {dimension_numbers = #tpu.dot_dimension_numbers<[1], [0], [0], [1], [0, 0, 1, 1], [], []>} : vector<8x64xbf16>, vector<64x256xbf16>, vector<8x256xf32> -> vector<8x256xf32>
    %c0_5 = arith.constant 0 : index
    %c0_6 = arith.constant 0 : index
    %6 = vector.load %arg4[%c0_5, %c0_6] : memref<1x256xf32, #tpu.memory_space<vmem>>, vector<1x256xf32>
    %7 = vector.broadcast %6 : vector<1x256xf32> to vector<8x256xf32>
    %8 = arith.addf %5, %7 : vector<8x256xf32>
    %cst_7 = arith.constant 0.000000e+00 : f32
    %9 = vector.broadcast %cst_7 : f32 to vector<8x256xf32>
    %10 = arith.maximumf %8, %9 : vector<8x256xf32>
    %11 = arith.truncf %10 : vector<8x256xf32> to vector<8x256xbf16>
    %c0_8 = arith.constant 0 : index
    %c0_9 = arith.constant 0 : index
    %12 = vector.load %arg5[%c0_8, %c0_9] : memref<128x256xbf16, #tpu.memory_space<vmem>>, vector<128x256xbf16>
    %cst_10 = arith.constant dense<0.000000e+00> : vector<8x256xf32>
    %13 = tpu.matmul %3, %12, %cst_10 {dimension_numbers = #tpu.dot_dimension_numbers<[1], [0], [0], [1], [0, 0, 1, 1], [], []>} : vector<8x128xbf16>, vector<128x256xbf16>, vector<8x256xf32> -> vector<8x256xf32>
    %c0_11 = arith.constant 0 : index
    %c0_12 = arith.constant 0 : index
    %14 = vector.load %arg6[%c0_11, %c0_12] : memref<1x256xf32, #tpu.memory_space<vmem>>, vector<1x256xf32>
    %15 = vector.broadcast %14 : vector<1x256xf32> to vector<8x256xf32>
    %16 = arith.addf %13, %15 : vector<8x256xf32>
    %cst_13 = arith.constant 0.000000e+00 : f32
    %17 = vector.broadcast %cst_13 : f32 to vector<8x256xf32>
    %18 = arith.maximumf %16, %17 : vector<8x256xf32>
    %19 = arith.truncf %18 : vector<8x256xf32> to vector<8x256xbf16>
    %c0_14 = arith.constant 0 : index
    %c0_15 = arith.constant 0 : index
    %20 = vector.load %arg7[%c0_14, %c0_15] : memref<256x128xbf16, #tpu.memory_space<vmem>>, vector<256x128xbf16>
    %cst_16 = arith.constant dense<0.000000e+00> : vector<8x128xf32>
    %21 = tpu.matmul %11, %20, %cst_16 {dimension_numbers = #tpu.dot_dimension_numbers<[1], [0], [0], [1], [0, 0, 1, 1], [], []>} : vector<8x256xbf16>, vector<256x128xbf16>, vector<8x128xf32> -> vector<8x128xf32>
    %c0_17 = arith.constant 0 : index
    %c0_18 = arith.constant 0 : index
    %22 = vector.load %arg8[%c0_17, %c0_18] : memref<256x128xbf16, #tpu.memory_space<vmem>>, vector<256x128xbf16>
    %cst_19 = arith.constant dense<0.000000e+00> : vector<8x128xf32>
    %23 = tpu.matmul %19, %22, %cst_19 {dimension_numbers = #tpu.dot_dimension_numbers<[1], [0], [0], [1], [0, 0, 1, 1], [], []>} : vector<8x256xbf16>, vector<256x128xbf16>, vector<8x128xf32> -> vector<8x128xf32>
    %24 = arith.addf %21, %23 : vector<8x128xf32>
    %c0_20 = arith.constant 0 : index
    %c0_21 = arith.constant 0 : index
    %25 = vector.load %arg9[%c0_20, %c0_21] : memref<1x128xf32, #tpu.memory_space<vmem>>, vector<1x128xf32>
    %26 = vector.broadcast %25 : vector<1x128xf32> to vector<8x128xf32>
    %27 = arith.addf %24, %26 : vector<8x128xf32>
    %cst_22 = arith.constant 0.000000e+00 : f32
    %28 = vector.broadcast %cst_22 : f32 to vector<8x128xf32>
    %29 = arith.maximumf %27, %28 : vector<8x128xf32>
    %30 = arith.truncf %29 : vector<8x128xf32> to vector<8x128xbf16>
    %c0_23 = arith.constant 0 : index
    %c0_24 = arith.constant 0 : index
    %31 = vector.load %arg10[%c0_23, %c0_24] : memref<128x128xbf16, #tpu.memory_space<vmem>>, vector<128x128xbf16>
    %cst_25 = arith.constant dense<0.000000e+00> : vector<8x128xf32>
    %32 = tpu.matmul %30, %31, %cst_25 {dimension_numbers = #tpu.dot_dimension_numbers<[1], [0], [0], [1], [0, 0, 1, 1], [], []>} : vector<8x128xbf16>, vector<128x128xbf16>, vector<8x128xf32> -> vector<8x128xf32>
    %c0_26 = arith.constant 0 : index
    %c0_27 = arith.constant 0 : index
    %33 = vector.load %arg11[%c0_26, %c0_27] : memref<1x128xf32, #tpu.memory_space<vmem>>, vector<1x128xf32>
    %34 = vector.broadcast %33 : vector<1x128xf32> to vector<8x128xf32>
    %35 = arith.addf %32, %34 : vector<8x128xf32>
    %36 = arith.truncf %35 : vector<8x128xf32> to vector<8x128xbf16>
    %c0_28 = arith.constant 0 : index
    %c0_29 = arith.constant 0 : index
    %37 = vector.load %arg12[%c0_28, %c0_29] : memref<8x128xbf16, #tpu.memory_space<vmem>>, vector<8x128xbf16>
    tpu.vector_store %arg12[%c0_28, %c0_29], %36 {strides = array<i32>} : memref<8x128xbf16, #tpu.memory_space<vmem>>, vector<8x128xbf16>,
    return
  }
  func.func @transform_0(%arg0: i32) -> (i32, i32) {
    %c0_i32 = arith.constant 0 : i32
    %c0_i32_0 = arith.constant 0 : i32
    return %arg0, %c0_i32 : i32, i32
  }
  func.func @transform_1(%arg0: i32) -> (i32, i32) {
    %c0_i32 = arith.constant 0 : i32
    %c0_i32_0 = arith.constant 0 : i32
    return %arg0, %c0_i32 : i32, i32
  }
  func.func @transform_2(%arg0: i32) -> (i32, i32) {
    %c0_i32 = arith.constant 0 : i32
    %c0_i32_0 = arith.constant 0 : i32
    %c0_i32_1 = arith.constant 0 : i32
    return %c0_i32, %c0_i32_0 : i32, i32
  }
  func.func @transform_3(%arg0: i32) -> (i32, i32) {
    %c0_i32 = arith.constant 0 : i32
    %c0_i32_0 = arith.constant 0 : i32
    %c0_i32_1 = arith.constant 0 : i32
    return %c0_i32, %c0_i32_0 : i32, i32
  }
  func.func @transform_4(%arg0: i32) -> (i32, i32) {
    %c0_i32 = arith.constant 0 : i32
    %c0_i32_0 = arith.constant 0 : i32
    %c0_i32_1 = arith.constant 0 : i32
    return %c0_i32, %c0_i32_0 : i32, i32
  }
  func.func @transform_5(%arg0: i32) -> (i32, i32) {
    %c0_i32 = arith.constant 0 : i32
    %c0_i32_0 = arith.constant 0 : i32
    %c0_i32_1 = arith.constant 0 : i32
    return %c0_i32, %c0_i32_0 : i32, i32
  }
  func.func @transform_6(%arg0: i32) -> (i32, i32) {
    %c0_i32 = arith.constant 0 : i32
    %c0_i32_0 = arith.constant 0 : i32
    %c0_i32_1 = arith.constant 0 : i32
    return %c0_i32, %c0_i32_0 : i32, i32
  }
  func.func @transform_7(%arg0: i32) -> (i32, i32) {
    %c0_i32 = arith.constant 0 : i32
    %c0_i32_0 = arith.constant 0 : i32
    %c0_i32_1 = arith.constant 0 : i32
    return %c0_i32, %c0_i32_0 : i32, i32
  }
  func.func @transform_8(%arg0: i32) -> (i32, i32) {
    %c0_i32 = arith.constant 0 : i32
    %c0_i32_0 = arith.constant 0 : i32
    %c0_i32_1 = arith.constant 0 : i32
    return %c0_i32, %c0_i32_0 : i32, i32
  }
  func.func @transform_9(%arg0: i32) -> (i32, i32) {
    %c0_i32 = arith.constant 0 : i32
    %c0_i32_0 = arith.constant 0 : i32
    %c0_i32_1 = arith.constant 0 : i32
    return %c0_i32, %c0_i32_0 : i32, i32
  }
  func.func @transform_10(%arg0: i32) -> (i32, i32) {
    %c0_i32 = arith.constant 0 : i32
    %c0_i32_0 = arith.constant 0 : i32
    %c0_i32_1 = arith.constant 0 : i32
    return %c0_i32, %c0_i32_0 : i32, i32
  }
  func.func @transform_11(%arg0: i32) -> (i32, i32) {
    %c0_i32 = arith.constant 0 : i32
    %c0_i32_0 = arith.constant 0 : i32
    return %arg0, %c0_i32 : i32, i32
  }
}

</mosaic_0001>

<bundles_post_ra>
// kernel: forward.1
= control target key start
LH: loop header
LB: loop body
LE: loop exit
PB: predicated region body
PF: predicated region fallthrough
CT: control target
= control target key end

     0   :  { %v987_v1 = vmov 0   ;;  %vm103_vm0 = vcmask 523264   ;;  %v988_v61 = vmov 0.0   ;;  %v53_v62 = vlaneseq  ;;  %s1263_s4 = inlined_call_operand.vmem [shape: bf16[128,256], index: 4, kind: input, shape index: {}]   ;;  %s1264_s2 = inlined_call_operand.vmem [shape: bf16[64,256], index: 2, kind: input, shape index: {}]   ;;  %s1265_s0 = inlined_call_operand.vmem [shape: f32[8,64], index: 0, kind: input, shape index: {}]   ;;  %s1266_s6 = inlined_call_operand.vmem [shape: bf16[256,128], index: 6, kind: input, shape index: {}]   ;;  %s1267_s7 = inlined_call_operand.vmem [shape: bf16[256,128], index: 7, kind: input, shape index: {}]   ;;  %s1268_s1 = inlined_call_operand.vmem [shape: f32[8,128], index: 1, kind: input, shape index: {}]   ;;  %s1269_s9 = inlined_call_operand.vmem [shape: bf16[128,128], index: 9, kind: input, shape index: {}]   ;;  %s1270_s3 = inlined_call_operand.vmem [shape: f32[1,256], index: 3, kind: input, shape index: {}]   ;;  %s1271_s5 = inlined_call_operand.vmem [shape: f32[1,256], index: 5, kind: input, shape index: {}]   ;;  %s1272_s8 = inlined_call_operand.vmem [shape: f32[1,128], index: 8, kind: input, shape index: {}]   ;;  %s1273_s10 = inlined_call_operand.vmem [shape: f32[1,128], index: 10, kind: input, shape index: {}]   ;;  %s1274_s11 = inlined_call_operand.vmem [shape: bf16[8,128], index: 11, kind: output, shape index: {}]  }
   0x1   :  { %v911_v0 = vld [vmem:[%s1263_s4 + $0x4] ss:$8 sps:$4 sm:$0xff]   ;;  %139 = vmatprep.mubr.bf16.mxu0 %v987_v1  ;;  %292 = vmatprep.mubr.bf16.mxu1 %v987_v1  ;;  %v913_v2 = vld [vmem:[%s1263_s4] ss:$8 sps:$4 sm:$0xff]   ;;  %v914_v3 = vld [vmem:[%s1263_s4 + $0x14] ss:$8 sps:$4 sm:$0xff]  }
   0x2   :  { %260 = vmatprep.subr.bf16.mxu1 %v911_v0  ;;  %v916_v4 = vld [vmem:[%s1263_s4 + $0x10] ss:$8 sps:$4 sm:$0xff]   ;;  %v917_v5 = vld [vmem:[%s1263_s4 + $0x24] ss:$8 sps:$4 sm:$0xff]   ;;  %v922_v7 = vld [vmem:[%s1264_s2] ss:$8 sps:$4 sm:$0xff]  }
   0x3   :  { %261 = vmatpush1.bf16.msra.mxu1 %v913_v2  ;;  %v920_v6 = vld [vmem:[%s1264_s2 + $0x4] ss:$8 sps:$4 sm:$0xff]   ;;  %v919_v8 = vld [vmem:[%s1263_s4 + $0x20] ss:$8 sps:$4 sm:$0xff]   ;;  %v926_v9 = vld [vmem:[%s1264_s2 + $0x14] ss:$8 sps:$4 sm:$0xff]  }
   0x4   :  { %262 = vmatprep.subr.bf16.mxu1 %v914_v3  ;;  %107 = vmatprep.subr.bf16.mxu0 %v920_v6  ;;  %v928_v10 = vld [vmem:[%s1264_s2 + $0x10] ss:$8 sps:$4 sm:$0xff]   ;;  %v923_v11 = vld [vmem:[%s1263_s4 + $0x34] ss:$8 sps:$4 sm:$0xff]   ;;  %v932_v13 = vld [vmem:[%s1264_s2 + $0x24] ss:$8 sps:$4 sm:$0xff]  }
   0x5   :  { %108 = vmatpush1.bf16.msra.mxu0 %v922_v7  ;;  %v925_v12 = vld [vmem:[%s1263_s4 + $0x30] ss:$8 sps:$4 sm:$0xff]   ;;  %v929_v14 = vld [vmem:[%s1263_s4 + $0x44] ss:$8 sps:$4 sm:$0xff]   ;;  %v934_v15 = vld [vmem:[%s1264_s2 + $0x20] ss:$8 sps:$4 sm:$0xff]  }
   0x6   :  { %109 = vmatprep.subr.bf16.mxu0 %v926_v9  ;;  %v938_v16 = vld [vmem:[%s1264_s2 + $0x34] ss:$8 sps:$4 sm:$0xff]   ;;  %v931_v17 = vld [vmem:[%s1263_s4 + $0x40] ss:$8 sps:$4 sm:$0xff]   ;;  %v940_v18 = vld [vmem:[%s1264_s2 + $0x30] ss:$8 sps:$4 sm:$0xff]  }
   0x7   :  { %263 = vmatpush1.bf16.msra.mxu1 %v916_v4  ;;  %v39_v19 = vld [vmem:[%s1265_s0] sm:$0xff]  ;;  %v935_v20 = vld [vmem:[%s1263_s4 + $0x54] ss:$8 sps:$4 sm:$0xff]   ;;  %v937_v21 = vld [vmem:[%s1263_s4 + $0x50] ss:$8 sps:$4 sm:$0xff]   ;;  %v54_v63 = vshrl.u32 %v53_v62, 7 }
   0x8   :  { %264 = vmatprep.subr.bf16.mxu1 %v917_v5  ;;  %v40_v22 = vpack.c.bf16 %v39_v19, %v39_v19  ;;  %v941_v23 = vld [vmem:[%s1263_s4 + $0x64] ss:$8 sps:$4 sm:$0xff]   ;;  %v943_v25 = vld [vmem:[%s1263_s4 + $0x60] ss:$8 sps:$4 sm:$0xff]   ;;  %v944_v27 = vld [vmem:[%s1263_s4 + $0x74] ss:$8 sps:$4 sm:$0xff]  }
   0x9   :  { %110 = vmatpush1.bf16.msra.mxu0 %v928_v10  ;;  %v950_v24 = vld [vmem:[%s1267_s7 + $0x40] sm:$0xff]   ;;  %v954_v28 = vld [vmem:[%s1267_s7 + $0x48] sm:$0xff]   ;;  %v946_v29 = vld [vmem:[%s1263_s4 + $0x70] ss:$8 sps:$4 sm:$0xff]   ;;  %v55_v0 = vsub.s32 0, %v54_v63  ;;  %v59_v2 = vsub.s32 1, %v54_v63 }
   0xa   :  { %111 = vmatprep.subr.bf16.mxu0 %v932_v13  ;;  %v952_v26 = vld [vmem:[%s1267_s7] sm:$0xff]   ;;  %v956_v31 = vld [vmem:[%s1267_s7 + $0x8] sm:$0xff]   ;;  %v958_v33 = vld [vmem:[%s1267_s7 + $0x50] sm:$0xff]   ;;  %vm989_vm1 = vmmov 0  }
   0xb   :  { %265 = vmatpush1.bf16.msra.mxu1 %v919_v8  ;;  %v41_v30 = vld [vmem:[%s1268_s1] sm:$0xff]  ;;  %v960_v36 = vld [vmem:[%s1267_s7 + $0x10] sm:$0xff]   ;;  %v949_v37 = vld [vmem:[%s1266_s6 + $0x48] sm:$0xff]  }
   0xc   :  { %266 = vmatprep.subr.bf16.mxu1 %v923_v11  ;;  %v947_v32 = vld [vmem:[%s1266_s6 + $0x40] sm:$0xff]   ;;  %v42_v35 = vpack.c.bf16 %v41_v30, %v41_v30  ;;  %v962_v38 = vld [vmem:[%s1267_s7 + $0x58] sm:$0xff]   ;;  %v951_v39 = vld [vmem:[%s1266_s6 + $0x8] sm:$0xff]  }
   0xd   :  { %112 = vmatpush1.bf16.msra.mxu0 %v934_v15  ;;  %v948_v34 = vld [vmem:[%s1266_s6] sm:$0xff]   ;;  %v964_v40 = vld [vmem:[%s1267_s7 + $0x18] sm:$0xff]   ;;  %v953_v41 = vld [vmem:[%s1266_s6 + $0x50] sm:$0xff]  }
   0xe   :  { %113 = vmatprep.subr.bf16.mxu0 %v938_v16  ;;  %v966_v42 = vld [vmem:[%s1267_s7 + $0x60] sm:$0xff]   ;;  %v955_v43 = vld [vmem:[%s1266_s6 + $0x10] sm:$0xff]   ;;  %v957_v44 = vld [vmem:[%s1266_s6 + $0x58] sm:$0xff]  }
   0xf   :  { %267 = vmatpush1.bf16.msra.mxu1 %v925_v12  ;;  %v968_v45 = vld [vmem:[%s1267_s7 + $0x20] sm:$0xff]   ;;  %v959_v46 = vld [vmem:[%s1266_s6 + $0x18] sm:$0xff]   ;;  %v965_v49 = vld [vmem:[%s1266_s6 + $0x68] sm:$0xff]  }
  0x10   :  { %268 = vmatprep.subr.bf16.mxu1 %v929_v14  ;;  %v961_v47 = vld [vmem:[%s1266_s6 + $0x60] sm:$0xff]   ;;  %v967_v50 = vld [vmem:[%s1266_s6 + $0x28] sm:$0xff]   ;;  %v969_v51 = vld [vmem:[%s1266_s6 + $0x70] sm:$0xff]  }
  0x11   :  { %114 = vmatpush1.bf16.msra.mxu0 %v940_v18  ;;  %v963_v48 = vld [vmem:[%s1266_s6 + $0x20] sm:$0xff]   ;;  %v970_v52 = vld [vmem:[%s1267_s7 + $0x68] sm:$0xff]   ;;  %v971_v53 = vld [vmem:[%s1266_s6 + $0x30] sm:$0xff]  }
  0x12   :  { %835 = vmatprep.subr.bf16.mxu0 %v950_v24  ;;  %v972_v54 = vld [vmem:[%s1267_s7 + $0x28] sm:$0xff]   ;;  %v973_v55 = vld [vmem:[%s1266_s6 + $0x78] sm:$0xff]   ;;  %v974_v56 = vld [vmem:[%s1267_s7 + $0x70] sm:$0xff]  }
  0x13   :  { %269 = vmatpush1.bf16.msra.mxu1 %v931_v17  ;;  %v975_v57 = vld [vmem:[%s1266_s6 + $0x38] sm:$0xff]   ;;  %v976_v58 = vld [vmem:[%s1267_s7 + $0x30] sm:$0xff]   ;;  %v51_v1 = vld [vmem:[%s1270_s3] sm:$0x3] }
  0x14   :  { %270 = vmatprep.subr.bf16.mxu1 %v935_v20  ;;  %776 = vmatmul.mubr.msk.bf16.vlgmr.msra.gmra.mrb[0].mxu0 %vm103_vm0, %v40_v22  ;;  %v977_v59 = vld [vmem:[%s1267_s7 + $0x78] sm:$0xff]   ;;  %v56_v3 = vrot.slane %v51_v1, %v55_v0  ;;  %v60_v4 = vrot.slane %v51_v1, %v59_v2  ;;  %v168_v15 = vld [vmem:[%s1271_s5] sm:$0x3]  ;;  %v981_v30 = vld [vmem:[%s1269_s9 + $0x10] sm:$0xff]  }
  0x15   :  { %836 = vmatpush3.bf16.msra.mxu0 %v952_v26  ;;  %v978_v60 = vld [vmem:[%s1267_s7 + $0x38] sm:$0xff]   ;;  %v173_v16 = vrot.slane %v168_v15, %v55_v0  ;;  %v177_v17 = vrot.slane %v168_v15, %v59_v2 }
  0x16   :  { %837 = vmatprep.subr.bf16.mxu0 %v954_v28 }
  0x17   :  { %271 = vmatpush1.bf16.msra.mxu1 %v937_v21 }
  0x18   :  { %272 = vmatprep.subr.bf16.mxu1 %v941_v23 }
  0x19   :  { %838 = vmatpush3.bf16.msra.mxu0 %v956_v31  ;;  %v982_v31 = vld [vmem:[%s1269_s9 + $0x18] sm:$0xff]  }
  0x1a   :  { %839 = vmatprep.subr.bf16.mxu0 %v958_v33  ;;  %v984_v33 = vld [vmem:[%s1269_s9 + $0x28] sm:$0xff]  }
  0x1b   :  { %273 = vmatpush1.bf16.msra.mxu1 %v943_v25 }
  0x1c   :  { %274 = vmatprep.subr.bf16.mxu1 %v944_v27  ;;  %v979_v27 = vld [vmem:[%s1269_s9] sm:$0xff]  }
  0x1d   :  { %840 = vmatpush3.bf16.msra.mxu0 %v960_v36 }
  0x1e   :  { %841 = vmatprep.subr.bf16.mxu0 %v962_v38 }
  0x1f   :  { %275 = vmatpush1.bf16.msra.mxu1 %v946_v29  ;;  %v980_v29 = vld [vmem:[%s1269_s9 + $0x8] sm:$0xff]  }
  0x20   :  { %857 = vmatprep.subr.bf16.mxu1 %v947_v32  ;;  %v983_v32 = vld [vmem:[%s1269_s9 + $0x20] sm:$0xff]  }
  0x21   :  { %842 = vmatpush3.bf16.msra.mxu0 %v964_v40 }
  0x22   :  { %293 = vmatmul.mubr.bf16.vlgmr.msra.gmra.mrb[0].mxu1 %v42_v35  ;;  %843 = vmatprep.subr.bf16.mxu0 %v966_v42  ;;  %v986_v35 = vld [vmem:[%s1269_s9 + $0x38] sm:$0xff]  }
  0x23   :  { %858 = vmatpush3.bf16.msra.mxu1 %v948_v34  ;;  %v985_v34 = vld [vmem:[%s1269_s9 + $0x30] sm:$0xff]  }
  0x24   :  { %859 = vmatprep.subr.bf16.mxu1 %v949_v37 }
  0x25   :  { %844 = vmatpush3.bf16.msra.mxu0 %v968_v45  ;;  %v825_v45 = vld [vmem:[%s1272_s8] ss:$0 sm:$0xff] }
  0x26   :  { %845 = vmatprep.subr.bf16.mxu0 %v970_v52 }
  0x27   :  { %860 = vmatpush3.bf16.msra.mxu1 %v951_v39 }
  0x28   :  { %861 = vmatprep.subr.bf16.mxu1 %v953_v41 }
  0x29   :  { %846 = vmatpush3.bf16.msra.mxu0 %v972_v54 }
  0x2a   :  { %847 = vmatprep.subr.bf16.mxu0 %v974_v56 }
  0x2b   :  { %862 = vmatpush3.bf16.msra.mxu1 %v955_v43 }
  0x2c   :  { %863 = vmatprep.subr.bf16.mxu1 %v957_v44 }
  0x2d   :  { %848 = vmatpush3.bf16.msra.mxu0 %v976_v58 }
  0x2e   :  { %849 = vmatprep.subr.bf16.mxu0 %v977_v59 }
  0x2f   :  { %864 = vmatpush3.bf16.msra.mxu1 %v959_v46 }
  0x30   :  { %865 = vmatprep.subr.bf16.mxu1 %v961_v47 }
  0x31   :  { %850 = vmatpush3.bf16.msra.mxu0 %v978_v60 }
  0x32   :  { %888 = vmatprep.subr.bf16.mxu0 %v988_v61 }
  0x33   :  { %866 = vmatpush3.bf16.msra.mxu1 %v963_v48 }
  0x34   :  { %867 = vmatprep.subr.bf16.mxu1 %v965_v49 }
  0x37   :  { %868 = vmatpush3.bf16.msra.mxu1 %v967_v50 }
  0x38   :  { %869 = vmatprep.subr.bf16.mxu1 %v969_v51  ;;  %v826_v51 = vld [vmem:[%s1273_s10] ss:$0 sm:$0xff] }
  0x3b   :  { %870 = vmatpush3.bf16.msra.mxu1 %v971_v53 }
  0x3c   :  { %871 = vmatprep.subr.bf16.mxu1 %v973_v55 }
  0x3f   :  { %872 = vmatpush3.bf16.msra.mxu1 %v975_v57 }
  0xe7   :  { %v141_v5 = vpop.f32.mrb[0].mxu0 }
  0xe8   :  { %v142_v6 = vadd.f32 %v141_v5, %v56_v3  ;;  %v143_v7 = vpop.f32.mrb[1].mxu0 }
  0xe9   :  { %v144_v8 = vadd.f32 %v143_v7, %v60_v4  ;;  %v145_v9 = vpop.f32.mrb[2].mxu0 }
  0xea   :  { %v148_v10 = vmax.f32 %v142_v6, 0.0  ;;  %v146_v11 = vpop.f32.mrb[3].mxu0 }
  0xeb   :  { %v149_v12 = vmax.f32 %v144_v8, 0.0 }
  0xec   :  { %v150_v13 = vpack.c.bf16 %v148_v10, %v148_v10 }
  0xed   :  { %v151_v14 = vpack.c.bf16 %v149_v12, %v149_v12 }
  0xef   :  { %633 = vmatprep.mubr.bf16.mxu1 %v151_v14 }
  0xf0   :  { %634 = vmatmul.mubr.bf16.vlgmr.msra.gmra.mrb[4].mxu1 %v150_v13 }
  0xf5   :  { %v294_v18 = vpop.f32.mrb[0].mxu1 }
  0xf6   :  { %v295_v19 = vadd.f32 %v294_v18, %v173_v16  ;;  %v296_v20 = vpop.f32.mrb[1].mxu1 }
  0xf7   :  { %v297_v21 = vadd.f32 %v296_v20, %v177_v17  ;;  %v298_v22 = vpop.f32.mrb[2].mxu1 }
  0xf8   :  { %v301_v23 = vmax.f32 %v295_v19, 0.0  ;;  %v299_v24 = vpop.f32.mrb[3].mxu1 }
  0xf9   :  { %v302_v25 = vmax.f32 %v297_v21, 0.0 }
  0xfa   :  { %v303_v28 = vpack.c.bf16 %v301_v23, %v301_v23 }
  0xfb   :  { %v304_v26 = vpack.c.bf16 %v302_v25, %v302_v25 }
  0xfd   :  { %497 = vmatprep.mubr.bf16.mxu0 %v304_v26 }
  0xfe   :  { %498 = vmatmul.mubr.bf16.vlgmr.msra.gmra.mrb[4].mxu0 %v303_v28 }
  0xff   :  { %889 = vmatpush3.bf16.msra.mxu0 %v979_v27  ;;  %904 = vmatprep.mubr.msk.bf16.mxu0 %vm989_vm1, %v988_v61 }
 0x100   :  { %890 = vmatprep.subr.bf16.mxu0 %v988_v61 }
 0x103   :  { %891 = vmatpush3.bf16.msra.mxu0 %v980_v29 }
 0x104   :  { %892 = vmatprep.subr.bf16.mxu0 %v988_v61 }
 0x107   :  { %893 = vmatpush3.bf16.msra.mxu0 %v981_v30 }
 0x108   :  { %894 = vmatprep.subr.bf16.mxu0 %v988_v61 }
 0x10b   :  { %895 = vmatpush3.bf16.msra.mxu0 %v982_v31 }
 0x10c   :  { %896 = vmatprep.subr.bf16.mxu0 %v988_v61 }
 0x10f   :  { %897 = vmatpush3.bf16.msra.mxu0 %v983_v32 }
 0x110   :  { %898 = vmatprep.subr.bf16.mxu0 %v988_v61 }
 0x113   :  { %899 = vmatpush3.bf16.msra.mxu0 %v984_v33 }
 0x114   :  { %900 = vmatprep.subr.bf16.mxu0 %v988_v61 }
 0x117   :  { %901 = vmatpush3.bf16.msra.mxu0 %v985_v34 }
 0x118   :  { %902 = vmatprep.subr.bf16.mxu0 %v988_v61 }
 0x11b   :  { %903 = vmatpush3.bf16.msra.mxu0 %v986_v35 }
 0x1c3   :  { %v873_v36 = vpop.f32.mrb[4].mxu1 }
 0x1c4   :  { %v874_v37 = vpop.f32.mrb[5].mxu1 }
 0x1c5   :  { %v875_v38 = vadd.f32 %v874_v37, %v873_v36  ;;  %v876_v39 = vpop.f32.mrb[6].mxu1 }
 0x1c6   :  { %v877_v40 = vpop.f32.mrb[7].mxu1 }
 0x1d1   :  { %v851_v41 = vpop.f32.mrb[4].mxu0 }
 0x1d2   :  { %v852_v42 = vpop.f32.mrb[5].mxu0 }
 0x1d3   :  { %v853_v43 = vadd.f32 %v852_v42, %v851_v41  ;;  %v854_v44 = vpop.f32.mrb[6].mxu0 }
 0x1d4   :  { %v855_v46 = vpop.f32.mrb[7].mxu0 }
 0x1d5   :  { %v636_v47 = vadd.f32 %v875_v38, %v853_v43 }
 0x1d7   :  { %v648_v48 = vadd.f32 %v825_v45, %v636_v47 }
 0x1d9   :  { %v649_v49 = vmax.f32 %v648_v48, 0.0 }
 0x1db   :  { %v650_v50 = vpack.c.bf16 %v649_v49, %v649_v49 }
 0x1dd   :  { %905 = vmatmul.mubr.bf16.vlgmr.msra.gmra.mrb[8].mxu0 %v650_v50 }
 0x2b0   :  { %v756_v52 = vpop.f32.mrb[8].mxu0 }
 0x2b1   :  { %v757_v53 = vadd.f32 %v826_v51, %v756_v52  ;;  %v906_v54 = vpop.f32.mrb[9].mxu0 }
 0x2b2   :  { %v759_v55 = vpop.f32.mrb[10].mxu0 }
 0x2b3   :  { %v762_v56 = vpack.c.bf16 %v757_v53, %v757_v53  ;;  %v907_v57 = vpop.f32.mrb[11].mxu0 }
 0x2b5   :  { %763 = vst [vmem:[%s1274_s11] sm:$0xf] %v762_v56 }

</bundles_post_ra>
